<compile_context>
chip_gen: v6e
topology: v6e:2x2x1
jax: 0.10.0
libtpu: 0.0.40
codegen_flags: <defaults>
</compile_context>

<pallas_src>
import math

import jax
import jax.numpy as jnp
import numpy as np
from jax.experimental import pallas as pl
from jax.experimental.pallas import tpu as pltpu


def _mlp(x, w1_ref, b1_ref, w2_ref, b2_ref):
    """Linear -> ReLU -> Linear, all on the MXU/VPU in VMEM."""
    h = jnp.dot(x, w1_ref[...], preferred_element_type=jnp.float32) + b1_ref[...]
    h = jnp.maximum(h, 0.0)
    return jnp.dot(h, w2_ref[...], preferred_element_type=jnp.float32) + b2_ref[...]


def _voxel_attention_kernel(
    p_xyz_ref, v_xyz_ref, p_feat_ref, v_feat_ref,
    wd1, bd1, wd2, bd2,      # fc_delta  (3        -> D -> D)
    wa1, ba1, wa2, ba2,      # fc_alpha  (d_points -> D -> D), wa2/ba2 pre-scaled
    wb1, bb1, wb2, bb2,      # fc_beta   (d_points -> D -> D)
    wo1, bo1, wo2, bo2,      # fc_omega  (d_points -> D -> D)
    out_ref,
):
    nb, n, _ = p_xyz_ref.shape          # batches in this grid step, points per voxel
    _, m, d_points = v_feat_ref.shape
    d_model = wa2.shape[1]

    p_xyz = p_xyz_ref[...]              # [NB, N, 3]
    v_xyz = v_xyz_ref[...]              # [NB, 1, 3]
    p_feat = p_feat_ref[...]            # [NB, N, d_points]
    v_feat = v_feat_ref[...]            # [NB, M, d_points]

    # abs_distance(p_xyz, v_xyz.unsqueeze(1)).squeeze() -> |p - v|
    dist = jnp.abs(p_xyz - v_xyz)       # [NB, N, 3]

    # Stack the batch block into the sublane dim so each MLP is one matmul.
    # (only leading dims are merged; N and M are multiples of 8 at these shapes)
    dist2 = dist.reshape(nb * n, 3)
    pfeat2 = p_feat.reshape(nb * n, d_points)
    vfeat2 = v_feat.reshape(nb * m, d_points)

    pv = _mlp(dist2,  wd1, bd1, wd2, bd2)    # [NB*N, D]
    k  = _mlp(pfeat2, wb1, bb1, wb2, bb2)    # [NB*N, D]
    vv = _mlp(pfeat2, wo1, bo1, wo2, bo2)    # [NB*N, D]
    q  = _mlp(vfeat2, wa1, ba1, wa2, ba2)    # [NB*M, D] (already scaled by 1/sqrt(D))

    # q @ k^T + q @ pv^T  ==  q @ (k + pv)^T  — one fused contraction.
    kp = (k + pv).reshape(nb, n, d_model)    # [NB, N, D]
    q3 = q.reshape(nb, m, d_model)           # [NB, M, D]
    v3 = vv.reshape(nb, n, d_model)          # [NB, N, D]

    scores = jnp.einsum('bmd,bnd->bmn', q3, kp,
                        preferred_element_type=jnp.float32)   # [NB, M, N]

    # F.softmax(..., dim=-2): normalize over the M axis.
    s_max = jnp.max(scores, axis=1, keepdims=True)
    e = jnp.exp(scores - s_max)
    w = e * pl.reciprocal(jnp.sum(e, axis=1, keepdims=True), approx=True)  # [NB, M, N]

    # einsum('bnm,bmf->bnf', w, v) == batched w @ v; residual add of v_features.
    res = jnp.einsum('bmn,bnd->bmd', w, v3,
                     preferred_element_type=jnp.float32) + v_feat          # [NB, M, D]
    out_ref[...] = res.astype(out_ref.dtype)


def voxel_attention_pallas(p_xyz, v_xyz, p_features, v_features, params,
                           *, num_groups=None):
    B, N, _ = p_xyz.shape
    M = v_features.shape[1]
    d_points = p_features.shape[2]
    d_model = params["wa2"].shape[1]
    assert d_points == d_model, "residual `res + pre` requires d_points == d_model"

    # Grid = independent groups of batches. Default 2 groups keeps both v7x
    # TensorCores fed; each group stacks B // num_groups batches per step.
    if num_groups is None:
        num_groups = 2 if (B % 2 == 0 and B >= 2) else 1
    assert B % num_groups == 0, "B must be divisible by num_groups"
    BB = B // num_groups

    v_xyz3 = v_xyz.reshape(B, 1, 3)

    # Fold the 1/sqrt(d_model) score scaling into fc_alpha's second layer:
    # (x @ (s*W) + s*b) == s * (x @ W + b).
    scale = 1.0 / math.sqrt(d_model)
    scaled = {"wa2": params["wa2"] * scale, "ba2": params["ba2"] * scale}

    # Flatten weights into a fixed-order argument list (biases as (1, D)).
    weight_args = []
    weight_specs = []
    for name in ("d", "a", "b", "o"):
        for key in (f"w{name}1", f"b{name}1", f"w{name}2", f"b{name}2"):
            arr = scaled.get(key, params[key])
            if arr.ndim == 1:
                arr = arr.reshape(1, -1)
            weight_args.append(arr)
            weight_specs.append(pl.BlockSpec(arr.shape, lambda g: (0, 0)))

    in_specs = [
        pl.BlockSpec((BB, N, 3), lambda g: (g, 0, 0)),
        pl.BlockSpec((BB, 1, 3), lambda g: (g, 0, 0)),
        pl.BlockSpec((BB, N, d_points), lambda g: (g, 0, 0)),
        pl.BlockSpec((BB, M, d_points), lambda g: (g, 0, 0)),
    ] + weight_specs

    out_spec = pl.BlockSpec((BB, M, d_model), lambda g: (g, 0, 0))

    return pl.pallas_call(
        _voxel_attention_kernel,
        out_shape=jax.ShapeDtypeStruct((B, M, d_model), p_features.dtype),
        grid_spec=pltpu.PrefetchScalarGridSpec(
            num_scalar_prefetch=0,
            grid=(num_groups,),
            in_specs=in_specs,
            out_specs=out_spec,
        ),
        compiler_params=pltpu.CompilerParams(dimension_semantics=("parallel",)),
    )(p_xyz, v_xyz3, p_features, v_features, *weight_args)


def voxel_attention_ref(p_xyz, v_xyz, p_features, v_features, params):
    """Plain-JAX mirror of the PyTorch forward, for validation."""
    def mlp(x, w1, b1, w2, b2):
        return jnp.maximum(x @ w1 + b1, 0.0) @ w2 + b2

    dist = jnp.abs(p_xyz - v_xyz[:, None, :])                       # [B, N, 3]
    pv = mlp(dist, params["wd1"], params["bd1"], params["wd2"], params["bd2"])
    q = mlp(v_features, params["wa1"], params["ba1"], params["wa2"], params["ba2"])
    k = mlp(p_features, params["wb1"], params["bb1"], params["wb2"], params["bb2"])
    v = mlp(p_features, params["wo1"], params["bo1"], params["wo2"], params["bo2"])
    d_model = q.shape[-1]
    scores = (q @ jnp.swapaxes(k, 1, 2) + q @ jnp.swapaxes(pv, 1, 2)) / math.sqrt(d_model)
    w = jax.nn.softmax(scores, axis=-2)
    res = jnp.einsum("bnm,bmf->bnf", w, v) + v_features
    return res


def init_params(key, d_points, d_model):
    """Deterministic nn.Linear-style init (uniform +-1/sqrt(fan_in))."""
    def lin(k, din, dout):
        bound = 1.0 / math.sqrt(din)
        kw, kb = jax.random.split(k)
        w = jax.random.uniform(kw, (din, dout), jnp.float32, -bound, bound)
        b = jax.random.uniform(kb, (dout,), jnp.float32, -bound, bound)
        return w, b

    ins = {"d": 3, "a": d_points, "b": d_points, "o": d_points}
    keys = jax.random.split(key, 8)
    params = {}
    i = 0
    for name in ("d", "a", "b", "o"):
        params[f"w{name}1"], params[f"b{name}1"] = lin(keys[i], ins[name], d_model); i += 1
        params[f"w{name}2"], params[f"b{name}2"] = lin(keys[i], d_model, d_model); i += 1
    return params


if __name__ == "__main__":
    B, N, M = 4, 16, 8
    d_points = d_model = 32   # residual `res + pre` requires d_points == d_model

    key = jax.random.PRNGKey(0)
    k1, k2, k3, k4, kp = jax.random.split(key, 5)
    p_xyz = jax.random.normal(k1, (B, N, 3), jnp.float32)
    v_xyz = jax.random.normal(k2, (B, 3), jnp.float32)
    p_features = jax.random.normal(k3, (B, N, d_points), jnp.float32)
    v_features = jax.random.normal(k4, (B, M, d_points), jnp.float32)
    params = init_params(kp, d_points, d_model)

    out = voxel_attention_pallas(p_xyz, v_xyz, p_features, v_features, params)
    out = jax.block_until_ready(out)

    ref = voxel_attention_ref(p_xyz, v_xyz, p_features, v_features, params)
    assert out.shape == (B, M, d_model)
    # Slightly looser tolerance: the softmax denominator uses the approximate
    # EUP reciprocal (pl.reciprocal(..., approx=True)).
    np.testing.assert_allclose(np.asarray(out), np.asarray(ref), rtol=5e-3, atol=5e-3)
    print("KERNEL_OK")
</pallas_src>

<mosaic_0001>
module attributes {stable_mosaic.version = 11 : i64} {
  func.func @_voxel_attention_kernel(%arg0: i32, %arg1: memref<2x16x3xf32, #tpu.memory_space<vmem>>, %arg2: memref<2x1x3xf32, #tpu.memory_space<vmem>>, %arg3: memref<2x16x32xf32, #tpu.memory_space<vmem>>, %arg4: memref<2x8x32xf32, #tpu.memory_space<vmem>>, %arg5: memref<3x32xf32, #tpu.memory_space<vmem>>, %arg6: memref<1x32xf32, #tpu.memory_space<vmem>>, %arg7: memref<32x32xf32, #tpu.memory_space<vmem>>, %arg8: memref<1x32xf32, #tpu.memory_space<vmem>>, %arg9: memref<32x32xf32, #tpu.memory_space<vmem>>, %arg10: memref<1x32xf32, #tpu.memory_space<vmem>>, %arg11: memref<32x32xf32, #tpu.memory_space<vmem>>, %arg12: memref<1x32xf32, #tpu.memory_space<vmem>>, %arg13: memref<32x32xf32, #tpu.memory_space<vmem>>, %arg14: memref<1x32xf32, #tpu.memory_space<vmem>>, %arg15: memref<32x32xf32, #tpu.memory_space<vmem>>, %arg16: memref<1x32xf32, #tpu.memory_space<vmem>>, %arg17: memref<32x32xf32, #tpu.memory_space<vmem>>, %arg18: memref<1x32xf32, #tpu.memory_space<vmem>>, %arg19: memref<32x32xf32, #tpu.memory_space<vmem>>, %arg20: memref<1x32xf32, #tpu.memory_space<vmem>>, %arg21: memref<2x8x32xf32, #tpu.memory_space<vmem>>) attributes {dimension_semantics = [#tpu.dimension_semantics<parallel>], iteration_bounds = array<i64: 2>, scalar_prefetch = 0 : i64, scratch_operands = 0 : i64, tpu.core_type = #tpu.core_type<tc>, window_params = [{transform_indices = @transform_0, window_bounds = array<i64: 2, 16, 3>}, {transform_indices = @transform_1, window_bounds = array<i64: 2, 1, 3>}, {transform_indices = @transform_2, window_bounds = array<i64: 2, 16, 32>}, {transform_indices = @transform_3, window_bounds = array<i64: 2, 8, 32>}, {pipeline_mode = #tpu.pipeline_mode<synchronous>, transform_indices = @transform_4, window_bounds = array<i64: 3, 32>}, {pipeline_mode = #tpu.pipeline_mode<synchronous>, transform_indices = @transform_5, window_bounds = array<i64: 1, 32>}, {pipeline_mode = #tpu.pipeline_mode<synchronous>, transform_indices = @transform_6, window_bounds = array<i64: 32, 32>}, {pipeline_mode = #tpu.pipeline_mode<synchronous>, transform_indices = @transform_7, window_bounds = array<i64: 1, 32>}, {pipeline_mode = #tpu.pipeline_mode<synchronous>, transform_indices = @transform_8, window_bounds = array<i64: 32, 32>}, {pipeline_mode = #tpu.pipeline_mode<synchronous>, transform_indices = @transform_9, window_bounds = array<i64: 1, 32>}, {pipeline_mode = #tpu.pipeline_mode<synchronous>, transform_indices = @transform_10, window_bounds = array<i64: 32, 32>}, {pipeline_mode = #tpu.pipeline_mode<synchronous>, transform_indices = @transform_11, window_bounds = array<i64: 1, 32>}, {pipeline_mode = #tpu.pipeline_mode<synchronous>, transform_indices = @transform_12, window_bounds = array<i64: 32, 32>}, {pipeline_mode = #tpu.pipeline_mode<synchronous>, transform_indices = @transform_13, window_bounds = array<i64: 1, 32>}, {pipeline_mode = #tpu.pipeline_mode<synchronous>, transform_indices = @transform_14, window_bounds = array<i64: 32, 32>}, {pipeline_mode = #tpu.pipeline_mode<synchronous>, transform_indices = @transform_15, window_bounds = array<i64: 1, 32>}, {pipeline_mode = #tpu.pipeline_mode<synchronous>, transform_indices = @transform_16, window_bounds = array<i64: 32, 32>}, {pipeline_mode = #tpu.pipeline_mode<synchronous>, transform_indices = @transform_17, window_bounds = array<i64: 1, 32>}, {pipeline_mode = #tpu.pipeline_mode<synchronous>, transform_indices = @transform_18, window_bounds = array<i64: 32, 32>}, {pipeline_mode = #tpu.pipeline_mode<synchronous>, transform_indices = @transform_19, window_bounds = array<i64: 1, 32>}, {transform_indices = @transform_20, window_bounds = array<i64: 2, 8, 32>}]} {
    %c0 = arith.constant 0 : index
    %c0_0 = arith.constant 0 : index
    %c0_1 = arith.constant 0 : index
    %0 = vector.load %arg1[%c0, %c0_0, %c0_1] : memref<2x16x3xf32, #tpu.memory_space<vmem>>, vector<2x16x3xf32>
    %c0_2 = arith.constant 0 : index
    %c0_3 = arith.constant 0 : index
    %c0_4 = arith.constant 0 : index
    %1 = vector.load %arg2[%c0_2, %c0_3, %c0_4] : memref<2x1x3xf32, #tpu.memory_space<vmem>>, vector<2x1x3xf32>
    %c0_5 = arith.constant 0 : index
    %c0_6 = arith.constant 0 : index
    %c0_7 = arith.constant 0 : index
    %2 = vector.load %arg3[%c0_5, %c0_6, %c0_7] : memref<2x16x32xf32, #tpu.memory_space<vmem>>, vector<2x16x32xf32>
    %c0_8 = arith.constant 0 : index
    %c0_9 = arith.constant 0 : index
    %c0_10 = arith.constant 0 : index
    %3 = vector.load %arg4[%c0_8, %c0_9, %c0_10] : memref<2x8x32xf32, #tpu.memory_space<vmem>>, vector<2x8x32xf32>
    %4 = vector.broadcast %1 : vector<2x1x3xf32> to vector<2x16x3xf32>
    %5 = arith.subf %0, %4 : vector<2x16x3xf32>
    %6 = math.absf %5 : vector<2x16x3xf32>
    %7 = vector.shape_cast %6 : vector<2x16x3xf32> to vector<32x3xf32>
    %8 = vector.shape_cast %2 : vector<2x16x32xf32> to vector<32x32xf32>
    %9 = vector.shape_cast %3 : vector<2x8x32xf32> to vector<16x32xf32>
    %c0_11 = arith.constant 0 : index
    %c0_12 = arith.constant 0 : index
    %10 = vector.load %arg5[%c0_11, %c0_12] : memref<3x32xf32, #tpu.memory_space<vmem>>, vector<3x32xf32>
    %cst = arith.constant dense<0.000000e+00> : vector<32x32xf32>
    %11 = tpu.matmul %7, %10, %cst {dimension_numbers = #tpu.dot_dimension_numbers<[1], [0], [0], [1], [0, 0, 1, 1], [], []>} : vector<32x3xf32>, vector<3x32xf32>, vector<32x32xf32> -> vector<32x32xf32>
    %c0_13 = arith.constant 0 : index
    %c0_14 = arith.constant 0 : index
    %12 = vector.load %arg6[%c0_13, %c0_14] : memref<1x32xf32, #tpu.memory_space<vmem>>, vector<1x32xf32>
    %13 = vector.broadcast %12 : vector<1x32xf32> to vector<32x32xf32>
    %14 = arith.addf %11, %13 : vector<32x32xf32>
    %cst_15 = arith.constant 0.000000e+00 : f32
    %15 = vector.broadcast %cst_15 : f32 to vector<32x32xf32>
    %16 = arith.maximumf %14, %15 : vector<32x32xf32>
    %c0_16 = arith.constant 0 : index
    %c0_17 = arith.constant 0 : index
    %17 = vector.load %arg7[%c0_16, %c0_17] : memref<32x32xf32, #tpu.memory_space<vmem>>, vector<32x32xf32>
    %cst_18 = arith.constant dense<0.000000e+00> : vector<32x32xf32>
    %18 = tpu.matmul %16, %17, %cst_18 {dimension_numbers = #tpu.dot_dimension_numbers<[1], [0], [0], [1], [0, 0, 1, 1], [], []>} : vector<32x32xf32>, vector<32x32xf32>, vector<32x32xf32> -> vector<32x32xf32>
    %c0_19 = arith.constant 0 : index
    %c0_20 = arith.constant 0 : index
    %19 = vector.load %arg8[%c0_19, %c0_20] : memref<1x32xf32, #tpu.memory_space<vmem>>, vector<1x32xf32>
    %20 = vector.broadcast %19 : vector<1x32xf32> to vector<32x32xf32>
    %21 = arith.addf %18, %20 : vector<32x32xf32>
    %c0_21 = arith.constant 0 : index
    %c0_22 = arith.constant 0 : index
    %22 = vector.load %arg13[%c0_21, %c0_22] : memref<32x32xf32, #tpu.memory_space<vmem>>, vector<32x32xf32>
    %cst_23 = arith.constant dense<0.000000e+00> : vector<32x32xf32>
    %23 = tpu.matmul %8, %22, %cst_23 {dimension_numbers = #tpu.dot_dimension_numbers<[1], [0], [0], [1], [0, 0, 1, 1], [], []>} : vector<32x32xf32>, vector<32x32xf32>, vector<32x32xf32> -> vector<32x32xf32>
    %c0_24 = arith.constant 0 : index
    %c0_25 = arith.constant 0 : index
    %24 = vector.load %arg14[%c0_24, %c0_25] : memref<1x32xf32, #tpu.memory_space<vmem>>, vector<1x32xf32>
    %25 = vector.broadcast %24 : vector<1x32xf32> to vector<32x32xf32>
    %26 = arith.addf %23, %25 : vector<32x32xf32>
    %cst_26 = arith.constant 0.000000e+00 : f32
    %27 = vector.broadcast %cst_26 : f32 to vector<32x32xf32>
    %28 = arith.maximumf %26, %27 : vector<32x32xf32>
    %c0_27 = arith.constant 0 : index
    %c0_28 = arith.constant 0 : index
    %29 = vector.load %arg15[%c0_27, %c0_28] : memref<32x32xf32, #tpu.memory_space<vmem>>, vector<32x32xf32>
    %cst_29 = arith.constant dense<0.000000e+00> : vector<32x32xf32>
    %30 = tpu.matmul %28, %29, %cst_29 {dimension_numbers = #tpu.dot_dimension_numbers<[1], [0], [0], [1], [0, 0, 1, 1], [], []>} : vector<32x32xf32>, vector<32x32xf32>, vector<32x32xf32> -> vector<32x32xf32>
    %c0_30 = arith.constant 0 : index
    %c0_31 = arith.constant 0 : index
    %31 = vector.load %arg16[%c0_30, %c0_31] : memref<1x32xf32, #tpu.memory_space<vmem>>, vector<1x32xf32>
    %32 = vector.broadcast %31 : vector<1x32xf32> to vector<32x32xf32>
    %33 = arith.addf %30, %32 : vector<32x32xf32>
    %c0_32 = arith.constant 0 : index
    %c0_33 = arith.constant 0 : index
    %34 = vector.load %arg17[%c0_32, %c0_33] : memref<32x32xf32, #tpu.memory_space<vmem>>, vector<32x32xf32>
    %cst_34 = arith.constant dense<0.000000e+00> : vector<32x32xf32>
    %35 = tpu.matmul %8, %34, %cst_34 {dimension_numbers = #tpu.dot_dimension_numbers<[1], [0], [0], [1], [0, 0, 1, 1], [], []>} : vector<32x32xf32>, vector<32x32xf32>, vector<32x32xf32> -> vector<32x32xf32>
    %c0_35 = arith.constant 0 : index
    %c0_36 = arith.constant 0 : index
    %36 = vector.load %arg18[%c0_35, %c0_36] : memref<1x32xf32, #tpu.memory_space<vmem>>, vector<1x32xf32>
    %37 = vector.broadcast %36 : vector<1x32xf32> to vector<32x32xf32>
    %38 = arith.addf %35, %37 : vector<32x32xf32>
    %cst_37 = arith.constant 0.000000e+00 : f32
    %39 = vector.broadcast %cst_37 : f32 to vector<32x32xf32>
    %40 = arith.maximumf %38, %39 : vector<32x32xf32>
    %c0_38 = arith.constant 0 : index
    %c0_39 = arith.constant 0 : index
    %41 = vector.load %arg19[%c0_38, %c0_39] : memref<32x32xf32, #tpu.memory_space<vmem>>, vector<32x32xf32>
    %cst_40 = arith.constant dense<0.000000e+00> : vector<32x32xf32>
    %42 = tpu.matmul %40, %41, %cst_40 {dimension_numbers = #tpu.dot_dimension_numbers<[1], [0], [0], [1], [0, 0, 1, 1], [], []>} : vector<32x32xf32>, vector<32x32xf32>, vector<32x32xf32> -> vector<32x32xf32>
    %c0_41 = arith.constant 0 : index
    %c0_42 = arith.constant 0 : index
    %43 = vector.load %arg20[%c0_41, %c0_42] : memref<1x32xf32, #tpu.memory_space<vmem>>, vector<1x32xf32>
    %44 = vector.broadcast %43 : vector<1x32xf32> to vector<32x32xf32>
    %45 = arith.addf %42, %44 : vector<32x32xf32>
    %c0_43 = arith.constant 0 : index
    %c0_44 = arith.constant 0 : index
    %46 = vector.load %arg9[%c0_43, %c0_44] : memref<32x32xf32, #tpu.memory_space<vmem>>, vector<32x32xf32>
    %cst_45 = arith.constant dense<0.000000e+00> : vector<16x32xf32>
    %47 = tpu.matmul %9, %46, %cst_45 {dimension_numbers = #tpu.dot_dimension_numbers<[1], [0], [0], [1], [0, 0, 1, 1], [], []>} : vector<16x32xf32>, vector<32x32xf32>, vector<16x32xf32> -> vector<16x32xf32>
    %c0_46 = arith.constant 0 : index
    %c0_47 = arith.constant 0 : index
    %48 = vector.load %arg10[%c0_46, %c0_47] : memref<1x32xf32, #tpu.memory_space<vmem>>, vector<1x32xf32>
    %49 = vector.broadcast %48 : vector<1x32xf32> to vector<16x32xf32>
    %50 = arith.addf %47, %49 : vector<16x32xf32>
    %cst_48 = arith.constant 0.000000e+00 : f32
    %51 = vector.broadcast %cst_48 : f32 to vector<16x32xf32>
    %52 = arith.maximumf %50, %51 : vector<16x32xf32>
    %c0_49 = arith.constant 0 : index
    %c0_50 = arith.constant 0 : index
    %53 = vector.load %arg11[%c0_49, %c0_50] : memref<32x32xf32, #tpu.memory_space<vmem>>, vector<32x32xf32>
    %cst_51 = arith.constant dense<0.000000e+00> : vector<16x32xf32>
    %54 = tpu.matmul %52, %53, %cst_51 {dimension_numbers = #tpu.dot_dimension_numbers<[1], [0], [0], [1], [0, 0, 1, 1], [], []>} : vector<16x32xf32>, vector<32x32xf32>, vector<16x32xf32> -> vector<16x32xf32>
    %c0_52 = arith.constant 0 : index
    %c0_53 = arith.constant 0 : index
    %55 = vector.load %arg12[%c0_52, %c0_53] : memref<1x32xf32, #tpu.memory_space<vmem>>, vector<1x32xf32>
    %56 = vector.broadcast %55 : vector<1x32xf32> to vector<16x32xf32>
    %57 = arith.addf %54, %56 : vector<16x32xf32>
    %58 = arith.addf %33, %21 : vector<32x32xf32>
    %59 = vector.shape_cast %58 : vector<32x32xf32> to vector<2x16x32xf32>
    %60 = vector.shape_cast %57 : vector<16x32xf32> to vector<2x8x32xf32>
    %61 = vector.shape_cast %45 : vector<32x32xf32> to vector<2x16x32xf32>
    "tpu.trace_start"() <{level = 10 : i32, message = "bmd,bnd->bmn"}> : () -> ()
    %cst_54 = arith.constant dense<0.000000e+00> : vector<2x8x16xf32>
    %62 = tpu.matmul %60, %59, %cst_54 {dimension_numbers = #tpu.dot_dimension_numbers<[2], [2], [1], [1], [0, 0, 0, 1, 1, 1], [0], [0]>} : vector<2x8x32xf32>, vector<2x16x32xf32>, vector<2x8x16xf32> -> vector<2x8x16xf32>
    "tpu.trace_stop"() : () -> ()
    %cst_55 = arith.constant dense<0xFF800000> : vector<2x16xf32>
    %63 = vector.multi_reduction <maximumf>, %62, %cst_55 [1] : vector<2x8x16xf32> to vector<2x16xf32>
    %64 = vector.shape_cast %63 : vector<2x16xf32> to vector<2x1x16xf32>
    %65 = vector.broadcast %64 : vector<2x1x16xf32> to vector<2x8x16xf32>
    %66 = arith.subf %62, %65 : vector<2x8x16xf32>
    %67 = math.exp %66 : vector<2x8x16xf32>
    %cst_56 = arith.constant dense<0.000000e+00> : vector<2x16xf32>
    %68 = vector.multi_reduction <add>, %67, %cst_56 [1] : vector<2x8x16xf32> to vector<2x16xf32>
    %69 = vector.shape_cast %68 : vector<2x16xf32> to vector<2x1x16xf32>
    %70 = tpu.reciprocal %69 {approx = true} : vector<2x1x16xf32> -> vector<2x1x16xf32>
    %71 = vector.broadcast %70 : vector<2x1x16xf32> to vector<2x8x16xf32>
    %72 = arith.mulf %67, %71 : vector<2x8x16xf32>
    "tpu.trace_start"() <{level = 10 : i32, message = "bmn,bnd->bmd"}> : () -> ()
    %cst_57 = arith.constant dense<0.000000e+00> : vector<2x8x32xf32>
    %73 = tpu.matmul %72, %61, %cst_57 {dimension_numbers = #tpu.dot_dimension_numbers<[2], [1], [1], [2], [0, 0, 0, 1, 1, 2], [0], [0]>} : vector<2x8x16xf32>, vector<2x16x32xf32>, vector<2x8x32xf32> -> vector<2x8x32xf32>
    "tpu.trace_stop"() : () -> ()
    %74 = arith.addf %73, %3 : vector<2x8x32xf32>
    %c0_58 = arith.constant 0 : index
    %c0_59 = arith.constant 0 : index
    %c0_60 = arith.constant 0 : index
    %75 = vector.load %arg21[%c0_58, %c0_59, %c0_60] : memref<2x8x32xf32, #tpu.memory_space<vmem>>, vector<2x8x32xf32>
    tpu.vector_store %arg21[%c0_58, %c0_59, %c0_60], %74 {strides = array<i32>} : memref<2x8x32xf32, #tpu.memory_space<vmem>>, vector<2x8x32xf32>,
    return
  }
  func.func @transform_0(%arg0: i32) -> (i32, i32, i32) {
    %c0_i32 = arith.constant 0 : i32
    %c0_i32_0 = arith.constant 0 : i32
    %c0_i32_1 = arith.constant 0 : i32
    return %arg0, %c0_i32, %c0_i32_0 : i32, i32, i32
  }
  func.func @transform_1(%arg0: i32) -> (i32, i32, i32) {
    %c0_i32 = arith.constant 0 : i32
    %c0_i32_0 = arith.constant 0 : i32
    %c0_i32_1 = arith.constant 0 : i32
    return %arg0, %c0_i32, %c0_i32_0 : i32, i32, i32
  }
  func.func @transform_2(%arg0: i32) -> (i32, i32, i32) {
    %c0_i32 = arith.constant 0 : i32
    %c0_i32_0 = arith.constant 0 : i32
    %c0_i32_1 = arith.constant 0 : i32
    return %arg0, %c0_i32, %c0_i32_0 : i32, i32, i32
  }
  func.func @transform_3(%arg0: i32) -> (i32, i32, i32) {
    %c0_i32 = arith.constant 0 : i32
    %c0_i32_0 = arith.constant 0 : i32
    %c0_i32_1 = arith.constant 0 : i32
    return %arg0, %c0_i32, %c0_i32_0 : i32, i32, i32
  }
  func.func @transform_4(%arg0: i32) -> (i32, i32) {
    %c0_i32 = arith.constant 0 : i32
    %c0_i32_0 = arith.constant 0 : i32
    %c0_i32_1 = arith.constant 0 : i32
    return %c0_i32, %c0_i32_0 : i32, i32
  }
  func.func @transform_5(%arg0: i32) -> (i32, i32) {
    %c0_i32 = arith.constant 0 : i32
    %c0_i32_0 = arith.constant 0 : i32
    %c0_i32_1 = arith.constant 0 : i32
    return %c0_i32, %c0_i32_0 : i32, i32
  }
  func.func @transform_6(%arg0: i32) -> (i32, i32) {
    %c0_i32 = arith.constant 0 : i32
    %c0_i32_0 = arith.constant 0 : i32
    %c0_i32_1 = arith.constant 0 : i32
    return %c0_i32, %c0_i32_0 : i32, i32
  }
  func.func @transform_7(%arg0: i32) -> (i32, i32) {
    %c0_i32 = arith.constant 0 : i32
    %c0_i32_0 = arith.constant 0 : i32
    %c0_i32_1 = arith.constant 0 : i32
    return %c0_i32, %c0_i32_0 : i32, i32
  }
  func.func @transform_8(%arg0: i32) -> (i32, i32) {
    %c0_i32 = arith.constant 0 : i32
    %c0_i32_0 = arith.constant 0 : i32
    %c0_i32_1 = arith.constant 0 : i32
    return %c0_i32, %c0_i32_0 : i32, i32
  }
  func.func @transform_9(%arg0: i32) -> (i32, i32) {
    %c0_i32 = arith.constant 0 : i32
    %c0_i32_0 = arith.constant 0 : i32
    %c0_i32_1 = arith.constant 0 : i32
    return %c0_i32, %c0_i32_0 : i32, i32
  }
  func.func @transform_10(%arg0: i32) -> (i32, i32) {
    %c0_i32 = arith.constant 0 : i32
    %c0_i32_0 = arith.constant 0 : i32
    %c0_i32_1 = arith.constant 0 : i32
    return %c0_i32, %c0_i32_0 : i32, i32
  }
  func.func @transform_11(%arg0: i32) -> (i32, i32) {
    %c0_i32 = arith.constant 0 : i32
    %c0_i32_0 = arith.constant 0 : i32
    %c0_i32_1 = arith.constant 0 : i32
    return %c0_i32, %c0_i32_0 : i32, i32
  }
  func.func @transform_12(%arg0: i32) -> (i32, i32) {
    %c0_i32 = arith.constant 0 : i32
    %c0_i32_0 = arith.constant 0 : i32
    %c0_i32_1 = arith.constant 0 : i32
    return %c0_i32, %c0_i32_0 : i32, i32
  }
  func.func @transform_13(%arg0: i32) -> (i32, i32) {
    %c0_i32 = arith.constant 0 : i32
    %c0_i32_0 = arith.constant 0 : i32
    %c0_i32_1 = arith.constant 0 : i32
    return %c0_i32, %c0_i32_0 : i32, i32
  }
  func.func @transform_14(%arg0: i32) -> (i32, i32) {
    %c0_i32 = arith.constant 0 : i32
    %c0_i32_0 = arith.constant 0 : i32
    %c0_i32_1 = arith.constant 0 : i32
    return %c0_i32, %c0_i32_0 : i32, i32
  }
  func.func @transform_15(%arg0: i32) -> (i32, i32) {
    %c0_i32 = arith.constant 0 : i32
    %c0_i32_0 = arith.constant 0 : i32
    %c0_i32_1 = arith.constant 0 : i32
    return %c0_i32, %c0_i32_0 : i32, i32
  }
  func.func @transform_16(%arg0: i32) -> (i32, i32) {
    %c0_i32 = arith.constant 0 : i32
    %c0_i32_0 = arith.constant 0 : i32
    %c0_i32_1 = arith.constant 0 : i32
    return %c0_i32, %c0_i32_0 : i32, i32
  }
  func.func @transform_17(%arg0: i32) -> (i32, i32) {
    %c0_i32 = arith.constant 0 : i32
    %c0_i32_0 = arith.constant 0 : i32
    %c0_i32_1 = arith.constant 0 : i32
    return %c0_i32, %c0_i32_0 : i32, i32
  }
  func.func @transform_18(%arg0: i32) -> (i32, i32) {
    %c0_i32 = arith.constant 0 : i32
    %c0_i32_0 = arith.constant 0 : i32
    %c0_i32_1 = arith.constant 0 : i32
    return %c0_i32, %c0_i32_0 : i32, i32
  }
  func.func @transform_19(%arg0: i32) -> (i32, i32) {
    %c0_i32 = arith.constant 0 : i32
    %c0_i32_0 = arith.constant 0 : i32
    %c0_i32_1 = arith.constant 0 : i32
    return %c0_i32, %c0_i32_0 : i32, i32
  }
  func.func @transform_20(%arg0: i32) -> (i32, i32, i32) {
    %c0_i32 = arith.constant 0 : i32
    %c0_i32_0 = arith.constant 0 : i32
    %c0_i32_1 = arith.constant 0 : i32
    return %arg0, %c0_i32, %c0_i32_0 : i32, i32, i32
  }
}

</mosaic_0001>

<bundles_post_ra>
// kernel: tpu_custom_call.1
= control target key start
LH: loop header
LB: loop body
LE: loop exit
PB: predicated region body
PF: predicated region fallthrough
CT: control target
= control target key end

     0   :  { %s3509_s0 = inlined_call_operand.vmem [shape: f32[4,16,3], index: 0, kind: input, shape index: {}]   ;;  %s3510_s1 = inlined_call_operand.vmem [shape: f32[4,1,3], index: 1, kind: input, shape index: {}]   ;;  %s3511_s2 = inlined_call_operand.vmem [shape: f32[4,16,32], index: 2, kind: input, shape index: {}]   ;;  %s3512_s3 = inlined_call_operand.hbm [shape: f32[4,8,32], index: 3, kind: input, shape index: {}]   ;;  %s3513_s4 = inlined_call_operand.hbm [shape: f32[3,32], index: 4, kind: input, shape index: {}]   ;;  %s3514_s5 = inlined_call_operand.vmem [shape: f32[1,32], index: 5, kind: input, shape index: {}]   ;;  %s3515_s6 = inlined_call_operand.hbm [shape: f32[32,32], index: 6, kind: input, shape index: {}]   ;;  %s3516_s7 = inlined_call_operand.hbm [shape: f32[1,32], index: 7, kind: input, shape index: {}]   ;;  %s3517_s8 = inlined_call_operand.vmem [shape: f32[32,32], index: 8, kind: input, shape index: {}]   ;;  %s3518_s9 = inlined_call_operand.vmem [shape: f32[1,32], index: 9, kind: input, shape index: {}]   ;;  %s3519_s10 = inlined_call_operand.hbm [shape: f32[32,32], index: 10, kind: input, shape index: {}]   ;;  %s3520_s11 = inlined_call_operand.vmem [shape: f32[1,32], index: 11, kind: input, shape index: {}]   ;;  %s3521_s12 = inlined_call_operand.hbm [shape: f32[32,32], index: 12, kind: input, shape index: {}]   ;;  %s3522_s13 = inlined_call_operand.vmem [shape: f32[1,32], index: 13, kind: input, shape index: {}]   ;;  %s3523_s14 = inlined_call_operand.hbm [shape: f32[32,32], index: 14, kind: input, shape index: {}]   ;;  %s3524_s15 = inlined_call_operand.vmem [shape: f32[1,32], index: 15, kind: input, shape index: {}]   ;;  %s3525_s16 = inlined_call_operand.hbm [shape: f32[32,32], index: 16, kind: input, shape index: {}]   ;;  %s3526_s17 = inlined_call_operand.vmem [shape: f32[1,32], index: 17, kind: input, shape index: {}]   ;;  %s3527_s18 = inlined_call_operand.hbm [shape: f32[32,32], index: 18, kind: input, shape index: {}]   ;;  %s3528_s19 = inlined_call_operand.vmem [shape: f32[1,32], index: 19, kind: input, shape index: {}]   ;;  %s3529_s20 = inlined_call_operand.hbm [shape: f32[4,8,32], index: 20, kind: output, shape index: {}]  }
   0x1   :  { %3538 = sst [smem:[#allocation24_spill]] %s3509_s0 }
   0x2   :  { %3539 = sst [smem:[#allocation25_spill]] %s3510_s1 }
   0x3   :  { %3540 = sst [smem:[#allocation26_spill]] %s3511_s2 }
   0x4   :  { %3541 = sst [smem:[#allocation27_spill]] %s3512_s3 }
   0x5   :  { %3542 = sst [smem:[#allocation28_spill]] %s3513_s4 }
   0x6   :  { %3543 = sst [smem:[#allocation29_spill]] %s3515_s6 }
   0x7   :  { %3544 = sst [smem:[#allocation30_spill]] %s3516_s7 }
   0x8   :  { %3545 = sst [smem:[#allocation31_spill]] %s3519_s10 }
   0x9   :  { %3546 = sst [smem:[#allocation32_spill]] %s3520_s11 }
   0xa   :  { %3547 = sst [smem:[#allocation33_spill]] %s3521_s12 }
   0xb   :  { %3548 = sst [smem:[#allocation34_spill]] %s3523_s14 }
   0xc   :  { %3549 = sst [smem:[#allocation35_spill]] %s3525_s16 }
   0xd   :  { %3550 = sst [smem:[#allocation36_spill]] %s3527_s18 }
   0xe   :  { %3551 = sst [smem:[#allocation37_spill]] %s3528_s19 }
   0xf   :  { %3552 = sst [smem:[#allocation38_spill]] %s3529_s20 }
  0x10   :  { %25 = vsyncpa [#allocation3], 0 }
  0x11   :  { %27 = vsyncpa [#allocation3 + $0x1], 0 }
  0x12   :  { %28 = vsyncpa [#allocation6], 0 }
  0x13   :  { %29 = vsyncpa [#allocation9], 0 }
  0x14   :  { %30 = vsyncpa [#allocation12], 0 }
  0x15   :  { %31 = vsyncpa [#allocation15], 0 }
  0x16   :  { %32 = vsyncpa [#allocation4], 0 }
  0x17   :  { %34 = vsyncpa [#allocation4 + $0x1], 0  ;;  %s3110_s1 = smov 0   ;;  %s3112_s22 = smov 0  }
  0x18   :  { %s3114_s23 = smov 0   ;;  %s3116_s24 = smov 0  }
  0x19 LB: > { %s2989_s2 = smov [#allocation5]   ;;  %s3131_s3 = sadd.s32 4294967295, %s2987_s24   ;;  %s2987_s24 = sphi %s3116_s24, %s3595_s24   ;;  %s2983_s23 = sphi %s3114_s23, %s3594_s23   ;;  %s2979_s22 = sphi %s3112_s22, %s3593_s22   ;;  %s2975_s1 = sphi %s3110_s1, %s3592_s1  }
  0x1a   : > { %s524_s25 = sshll.u32 %s2989_s2, 4  ;;  %p2246_p0 = scmp.ge.s32.totalorder %s2987_s24, 1  ;;  %s525_s25 = int_to_ptr.vmem [resolvable:$true] %s524_s25 }
  0x1b   : > { %p3532_p1 = scmp.eq.s32.totalorder %s3131_s3, 0  ;;  %p511_p2 = scmp.lt.s32.totalorder %s2987_s24, 3 }
  0x1c   : > { %s2990_s27 = smov [#allocation8]   ;;  %s2991_s29 = smov [#allocation11]  }
  0x1d   : > { %p3136_p3 = pnand %p2246_p0, %p511_p2  ;;  %s551_s28 = sshll.u32 %s2990_s27, 4  ;;  %s552_s28 = int_to_ptr.vmem [resolvable:$true] %s551_s28 }
  0x1e   : > { %s583_s30 = sshll.u32 %s2991_s29, 4  ;;  %s2682_s21 = scalar_lea.vmem %s525_s25, 64  ;;  %s3149_s30 = int_to_ptr.vmem [resolvable:$true] %s583_s30 }
  0x1f   : > { %s3553_s26 = scalar_select %p3136_p3, 1, 0 }
  0x20   : > { %p2566_p5 = pneg %p3136_p3  ;;  %p2683_p8 = scmp.ne.s32.totalorder %s525_s25, %s2682_s21 }
  0x21   : > { %p2690_p11 = scmp.lt.s32.totalorder %s525_s25, %s525_s25  ;;  %p2691_p12 = scmp.lt.s32.totalorder %s2682_s21, %s2682_s21 }
  0x22   : > { %p3145_p6 = pnand %p2566_p5, %p3532_p1 }
  0x23   : > { %p2692_p13 = por %p2691_p12, %p2690_p11 }
  0x24   : > { %p3153_p7 = pneg %p3145_p6 }
  0x26   : > { %p2685_p9 = pnand %p2683_p8, %p3153_p7 }
  0x28   : > { %p2686_p10 = pneg %p2685_p9 }
  0x2a   : > { %p2693_p0 = pnand %p2692_p13, %p2686_p10 }
  0x2c   : > { %2696 = shalt.err (!%p2693_p0)
}
  0x2d   : > { %s3556_s29 = sld [smem:[#allocation28_spill]]  ;;  %s2708_s20 = scalar_lea.vmem %s552_s28, 16 }
  0x2e   : > { %p2709_p2 = scmp.ne.s32.totalorder %s552_s28, %s2708_s20  ;;  %s2715_s11 = scalar_lea.vmem %s552_s28, 32 }
  0x2f   : > { %p2716_p8 = scmp.lt.s32.totalorder %s552_s28, %s552_s28  ;;  %p2717_p9 = scmp.lt.s32.totalorder %s2715_s11, %s2708_s20 }
  0x30   : > { %p2711_p5 = pnand %p2709_p2, %p3153_p7 }
  0x31   : > { %p2718_p1 = por %p2717_p9, %p2716_p8 }
  0x32   : > { %p2712_p4 = pneg %p2711_p5 }
  0x33   : > { %2569 = dma.hbm_to_vmem [thread:$0]  (!%p3145_p6), %s3556_s29, 64, %s525_s25, [#allocation6]  }
  0x34   : > { %p2719_p3 = pnand %p2718_p1, %p2712_p4 }
  0x36   : > { %2722 = shalt.err (!%p2719_p3)
}
  0x37   : > { %s3557_s7 = sld [smem:[#allocation30_spill]]  ;;  %s2734_s25 = scalar_lea.vmem %s3149_s30, 512 }
  0x38   : > { %p2735_p10 = scmp.ne.s32.totalorder %s3149_s30, %s2734_s25  ;;  %p2742_p13 = scmp.lt.s32.totalorder %s3149_s30, %s3149_s30 }
  0x39   : > { %p2743_p0 = scmp.lt.s32.totalorder %s2734_s25, %s2734_s25 }
  0x3a   : > { %p2737_p11 = pnand %p2735_p10, %p3153_p7 }
  0x3b   : > { %p2744_p1 = por %p2743_p0, %p2742_p13 }
  0x3c   : > { %p2738_p12 = pneg %p2737_p11 }
  0x3d   : > { %2575 = dma.hbm_to_vmem [thread:$0]  (!%p3145_p6), %s3557_s7, 16, %s552_s28, [#allocation9]  }
  0x3e   : > { %p2745_p3 = pnand %p2744_p1, %p2738_p12 }
  0x40   : > { %2748 = shalt.err (!%p2745_p3)
}
  0x41   : > { %s3534_s11 = smov 128   ;;  %s3535_s19 = smov 8  }
  0x42   : > { %s3558_s12 = sld [smem:[#allocation33_spill]]  ;;  %s2994_s2 = smov [#allocation14]  }
  0x43   : > { %s615_s27 = sshll.u32 %s2994_s2, 4  ;;  %s2995_s29 = smov [#allocation7]   ;;  %s616_s27 = int_to_ptr.vmem [resolvable:$true] %s615_s27 }
  0x44   : > { %s537_s21 = sshll.u32 %s2995_s29, 4  ;;  %s2760_s25 = scalar_lea.vmem %s616_s27, 512  ;;  %s538_s21 = int_to_ptr.vmem [resolvable:$true] %s537_s21 }
  0x45   : > { %p2761_p4 = scmp.ne.s32.totalorder %s616_s27, %s2760_s25  ;;  %p2768_p8 = scmp.lt.s32.totalorder %s616_s27, %s616_s27 }
  0x46   : > { %p2769_p9 = scmp.lt.s32.totalorder %s2760_s25, %s2760_s25 }
  0x47   : > { %p2763_p2 = pnand %p2761_p4, %p3153_p7 }
  0x48   : > { %2581 = dma.hbm_to_vmem [thread:$0]  (!%p3145_p6), %s3558_s12, 512, %s3149_s30, [#allocation12], %s3534_s11, %s3534_s11, %s3535_s19  }
  0x49   : > { %p2764_p5 = pneg %p2763_p2  ;;  %p2770_p10 = por %p2769_p9, %p2768_p8 }
  0x4b   : > { %p2771_p11 = pnand %p2770_p10, %p2764_p5 }
  0x4d   : > { %2774 = shalt.err (!%p2771_p11)
}
  0x4e   : > { %s3559_s16 = sld [smem:[#allocation35_spill]]  ;;  %s2786_s28 = scalar_lea.vmem %s538_s21, 512 }
  0x4f   : > { %p2787_p12 = scmp.ne.s32.totalorder %s538_s21, %s2786_s28  ;;  %p2794_p1 = scmp.lt.s32.totalorder %s538_s21, %s538_s21 }
  0x50   : > { %p2795_p3 = scmp.lt.s32.totalorder %s2786_s28, %s2786_s28 }
  0x51   : > { %p2789_p13 = pnand %p2787_p12, %p3153_p7 }
  0x52   : > { %p2796_p4 = por %p2795_p3, %p2794_p1 }
  0x53   : > { %p2790_p0 = pneg %p2789_p13 }
  0x54   : > { %2587 = dma.hbm_to_vmem [thread:$0]  (!%p3145_p6), %s3559_s16, 512, %s616_s27, [#allocation15], %s3534_s11, %s3534_s11, %s3535_s19  }
  0x55   : > { %p2797_p2 = pnand %p2796_p4, %p2790_p0 }
  0x57   : > { %2800 = shalt.err (!%p2797_p2)
}
  0x58   : > { %s3560_s6 = sld [smem:[#allocation29_spill]]  ;;  %s2996_s27 = smov [#allocation10]  }
  0x59   : > { %s567_s25 = sshll.u32 %s2996_s27, 4  ;;  %s2997_s30 = smov [#allocation13]   ;;  %s568_s25 = int_to_ptr.vmem [resolvable:$true] %s567_s25 }
  0x5a   : > { %s599_s20 = sshll.u32 %s2997_s30, 4  ;;  %s2812_s7 = scalar_lea.vmem %s568_s25, 512  ;;  %s600_s20 = int_to_ptr.vmem [resolvable:$true] %s599_s20 }
  0x5b   : > { %p2813_p5 = scmp.ne.s32.totalorder %s568_s25, %s2812_s7  ;;  %p2820_p10 = scmp.lt.s32.totalorder %s568_s25, %s568_s25 }
  0x5c   : > { %p2821_p11 = scmp.lt.s32.totalorder %s2812_s7, %s2812_s7 }
  0x5d   : > { %p2815_p8 = pnand %p2813_p5, %p3153_p7 }
  0x5e   : > { %2572 = dma.hbm_to_vmem [thread:$0]  (!%p3145_p6), %s3560_s6, 512, %s538_s21, [#allocation6], %s3534_s11, %s3534_s11, %s3535_s19  }
  0x5f   : > { %p2816_p9 = pneg %p2815_p8  ;;  %p2822_p12 = por %p2821_p11, %p2820_p10 }
  0x61   : > { %p2823_p13 = pnand %p2822_p12, %p2816_p9 }
  0x63   : > { %2826 = shalt.err (!%p2823_p13)
}
  0x64   : > { %s3561_s10 = sld [smem:[#allocation31_spill]]  ;;  %s2838_s2 = scalar_lea.vmem %s600_s20, 512 }
  0x65   : > { %p2839_p0 = scmp.ne.s32.totalorder %s600_s20, %s2838_s2  ;;  %p2846_p4 = scmp.lt.s32.totalorder %s600_s20, %s600_s20 }
  0x66   : > { %p2847_p2 = scmp.lt.s32.totalorder %s2838_s2, %s2838_s2 }
  0x67   : > { %p2841_p1 = pnand %p2839_p0, %p3153_p7 }
  0x68   : > { %p2848_p5 = por %p2847_p2, %p2846_p4 }
  0x69   : > { %p2842_p3 = pneg %p2841_p1 }
  0x6a   : > { %2578 = dma.hbm_to_vmem [thread:$0]  (!%p3145_p6), %s3561_s10, 512, %s568_s25, [#allocation9], %s3534_s11, %s3534_s11, %s3535_s19  }
  0x6b   : > { %p2849_p8 = pnand %p2848_p5, %p2842_p3 }
  0x6d   : > { %2852 = shalt.err (!%p2849_p8)
}
  0x6e   : > { %s3562_s14 = sld [smem:[#allocation34_spill]]  ;;  %s2998_s27 = smov [#allocation16]  }
  0x6f   : > { %s631_s25 = sshll.u32 %s2998_s27, 4  ;;  %s632_s25 = int_to_ptr.vmem [resolvable:$true] %s631_s25 }
  0x70   : > { %s2864_s30 = scalar_lea.vmem %s632_s25, 512  ;;  %p2872_p12 = scmp.lt.s32.totalorder %s632_s25, %s632_s25 }
  0x71   : > { %p2865_p9 = scmp.ne.s32.totalorder %s632_s25, %s2864_s30  ;;  %p2873_p13 = scmp.lt.s32.totalorder %s2864_s30, %s2864_s30 }
  0x73   : > { %p2867_p10 = pnand %p2865_p9, %p3153_p7  ;;  %p2874_p0 = por %p2873_p13, %p2872_p12 }
  0x74   : > { %2584 = dma.hbm_to_vmem [thread:$0]  (!%p3145_p6), %s3562_s14, 512, %s600_s20, [#allocation12], %s3534_s11, %s3534_s11, %s3535_s19  }
  0x75   : > { %p2868_p11 = pneg %p2867_p10 }
  0x77   : > { %p2875_p1 = pnand %p2874_p0, %p2868_p11 }
  0x79   : > { %2878 = shalt.err (!%p2875_p1)
}
  0x7a   : > { %s3563_s18 = sld [smem:[#allocation36_spill]]  ;;  %s2245_s4 = sadd.s32 4294967294, %s2987_s24  }
  0x7b   : > { %s3238_s0 = sadd.s32 1, %s2987_s24   ;;  %s125_s2 = sadd.s32 1, %s2983_s23 }
  0x7c   : > { %s122_s28 = ssub.s32 %s2987_s24, %s3238_s0  ;;  %p132_p3 = scmp.ne.s32.totalorder %s2983_s23, %s2979_s22 }
  0x7d   : > { %p123_p7 = scmp.eq.s32.totalorder %s122_s28, 0  ;;  %p133_p4 = scmp.eq.s32.totalorder %s2987_s24, 0 }
  0x7e   : > { %p138_p2 = scmp.ne.s32.totalorder %s2979_s22, %s2975_s1  ;;  %p3565_p8 = scmp.eq.s32.totalorder %s3131_s3, 0 }
  0x7f   : > { %s3249_s7 = scalar_select %p123_p7, %s2983_s23, %s125_s2  }
  0x80   : > { %2590 = dma.hbm_to_vmem [thread:$0]  (!%p3145_p6), %s3563_s18, 512, %s632_s25, [#allocation15], %s3534_s11, %s3534_s11, %s3535_s19  }
  0x81   : > { %p3251_p5 = por %p133_p4, %p132_p3  ;;  %p3257_p6 = por %p3565_p8, %p138_p2 }
  0x82   : > { %p498_p9 = scmp.eq.s32.totalorder %s3131_s3, 1  ;;  %p504_p10 = scmp.eq.s32.totalorder %s2245_s4, 1 }
  0x83   : > { %s3566_s27 = scalar_select %p3257_p6, 1, 0 }
  0x84   : > { %p2607_p11 = scmp.lt.s32.totalorder %s2987_s24, 2  ;;  %s676_s25 = sand.u32 1, %s2983_s23  }
  0x85   : > { %p3264_p12 = por %p498_p9, %p132_p3  ;;  %p3268_p13 = por %p504_p10, %p138_p2 }
  0x86   : > { %s2256_s20 = sshll.u32 %s676_s25, 4  ;;  %s2329_s28 = sshll.u32 %s2987_s24, 8 }
  0x87   : > { %s3567_s30 = scalar_select %p3264_p12, 1, 0 }
  0x88   : > { %s3568_s21 = scalar_select %p3268_p13, 1, 0 }
  0x89   : > { %s3569_s19 = sld [smem:[#allocation27_spill]]  ;;  %s680_s4 = scalar_lea.vmem [#allocation2], %s2256_s20 }
  0x8a   : > { %s687_s10 = sshll.u32 %s680_s4, 4  ;;  %p3282_p0 = pnand %p2607_p11, %p3251_p5  ;;  %s3278_s10 = int_to_ptr.vmem [resolvable:$true] %s687_s10 }
  0x8b   : > { %s3286_s14 = scalar_lea.sflag [#allocation3], %s676_s25 }
  0x8c   : > { %p2881_p7 = pneg %p3282_p0 }
  0x8f   : > { %s3276_s6 = scalar_lea.hbm %s3569_s19, %s2329_s28  ;;  %s2884_s20 = scalar_lea.hbm %s3569_s19, 512 }
  0x90   : > { %s2879_s16 = scalar_lea.hbm %s3276_s6, 256  ;;  %p2885_p2 = scmp.lt.s32.totalorder %s3276_s6, %s3569_s19 }
  0x91   : > { %p2880_p1 = scmp.ne.s32.totalorder %s3276_s6, %s2879_s16  ;;  %p2886_p5 = scmp.lt.s32.totalorder %s2884_s20, %s2879_s16 }
  0x93   : > { %p2882_p3 = pnand %p2881_p7, %p2880_p1  ;;  %p2887_p8 = por %p2886_p5, %p2885_p2 }
  0x95   : > { %p2883_p4 = pneg %p2882_p3 }
  0x97   : > { %p2888_p9 = pnand %p2887_p8, %p2883_p4 }
  0x99   : > { %2891 = shalt.err (!%p2888_p9)
}
  0x9a   : > { %s2892_s29 = scalar_lea.vmem %s3278_s10, 256  ;;  %s2999_s25 = smov [#allocation2]  }
  0x9b   : > { %p2893_p10 = scmp.ne.s32.totalorder %s3278_s10, %s2892_s29  ;;  %s2897_s18 = sshll.u32 %s2999_s25, 4  ;;  %s2898_s18 = int_to_ptr.vmem [resolvable:$false] %s2897_s18 }
  0x9c   : > { %s2899_s11 = scalar_lea.vmem %s2898_s18, 512  ;;  %p2900_p3 = scmp.lt.s32.totalorder %s3278_s10, %s2898_s18 }
  0x9d   : > { %p2895_p11 = pnand %p2893_p10, %p2881_p7  ;;  %p2901_p13 = scmp.lt.s32.totalorder %s2899_s11, %s2892_s29 }
  0x9f   : > { %p2896_p1 = pneg %p2895_p11  ;;  %p2902_p12 = por %p2901_p13, %p2900_p3 }
  0xa1   : > { %p2903_p6 = pnand %p2902_p12, %p2896_p1 }
  0xa3   : > { %2906 = shalt.err (!%p2903_p6)
}
  0xa4   : > { %s3571_s16 = smov 8   ;;  %s3572_s28 = smov 128  }
  0xa5   : > { %2594 = dma.hbm_to_vmem [thread:$0]  (!%p3282_p0), %s3276_s6, 256, %s3278_s10, %s3286_s14, %s3572_s28, %s3572_s28, %s3571_s16  }
  0xa6   : > { %p3573_p7 = scmp.ne.s32.totalorder %s3553_s26, 0 }
  0xa7   : > { %s3313_s20 = sand.u32 (!%p3573_p7), 1, %s2979_s22   ;;  %p3574_p6 = scmp.ne.s32.totalorder (!%p3573_p7), %s3566_s27, 0 }
  0xa8   : > { %699 = sbr.rel (%p3573_p7) target bundleno = 1087 (0x43f), region = 100  ;;  %s2260_s18 = sshll.u32 (!%p3573_p7), %s3313_s20, 4 }
  0xa9   : > { %s702_s2 = scalar_lea.sflag (!%p3573_p7), [#allocation3], %s3313_s20  ;;  %s3319_s12 = scalar_lea.vmem (!%p3573_p7), [#allocation2], %s2260_s18 }
  0xad   : > { %2950 = dma.done.wait (%p3574_p6), %s702_s2, 256  }
  0xae   : > { %2952 = vsyncadd (%p3574_p6), %s702_s2, 4294967040  ;;  %p3575_p12 = scmp.eq.s32.totalorder %s3131_s3, 0 }
  0xb0   : > { %2954 = dma.done.wait (%p3575_p12), [#allocation6], 576   ;;  %p3576_p13 = pmov %p3575_p12 }
  0xb1   : > { %p3577_p0 = pmov %p3575_p12 }
  0xb2   : > { %2956 = vsyncadd (%p3576_p13), [#allocation6], 4294966720 }
  0xb3   : > { %2958 = dma.done.wait (%p3577_p0), [#allocation9], 528   ;;  %p3578_p4 = pmov %p3577_p0 }
  0xb4   : > { %p3579_p2 = pmov %p3577_p0 }
  0xb5   : > { %2960 = vsyncadd (%p3578_p4), [#allocation9], 4294966768 }
  0xb6   : > { %2962 = dma.done.wait (%p3579_p2), [#allocation12], 1024   ;;  %p3580_p5 = pmov %p3577_p0 }
  0xb7   : > { %p3581_p8 = pmov %p3577_p0 }
  0xb8   : > { %2964 = vsyncadd (%p3580_p5), [#allocation12], 4294966272 }
  0xb9   : > { %2966 = dma.done.wait (%p3581_p8), [#allocation15], 1024   ;;  %p3582_p9 = pmov %p3577_p0 }
  0xba   : > { %s2270_s6 = sshll.u32 %s3131_s3, 1  ;;  %vm884_vm0 = vcmask 1042432   ;;  %s3583_s27 = sld [smem:[#allocation25_spill]]  ;;  %v863_v0 = vld [vmem:[#allocation5] sm:$0x7]  ;;  %vm871_vm1 = vcmask 23552  }
  0xbb   : > { %2968 = vsyncadd (%p3582_p9), [#allocation15], 4294966272  ;;  %p811_p10 = scmp.lt.s32.totalorder %s2270_s6, 3  ;;  %s3584_s11 = sld [smem:[#allocation24_spill]]  ;;  %2402 = vmatprep.subr.msk.mxu0 %vm884_vm0, %v863_v0  ;;  %v1089_v9 = vld [vmem:[#allocation11 + $0x18] sm:$0xff]  ;;  %v1088_v15 = vld [vmem:[#allocation11 + $0x10] sm:$0xff] }
  0xbc   : > { %2403 = vmatpush3.msk.msra.mxu0 %vm884_vm0, %v863_v0  ;;  %v1087_v17 = vld [vmem:[#allocation11 + $0x8] sm:$0xff]  ;;  %vm988_vm2 = vcmask 261120   ;;  %v980_v19 = vld [vmem:[#allocation7 + $0x18] sm:$0xff]  ;;  %v1086_v20 = vld [vmem:[#allocation11] sm:$0xff]  ;;  %vm3001_vm3 = vmmov 0   ;;  %vm1862_vm4 = vcmask 130048  }
  0xbd   : > { %s3597_s6 = smov (!%p811_p10, %s2270_s6), 3  ;;  %2424 = vmatprep.subr.mxu0 %v1089_v9  ;;  %2410 = vmatprep.subr.mxu1 %v980_v19  ;;  %v1309_v21 = vld [vmem:[#allocation14 + $0x18] sm:$0xff]  ;;  %v1308_v24 = vld [vmem:[#allocation14 + $0x10] sm:$0xff]  ;;  %v1307_v25 = vld [vmem:[#allocation14 + $0x8] sm:$0xff]  ;;  %p3589_p1 = scmp.ne.s32.totalorder %s3567_s30, 0 }
  0xbe   : > { %s2330_s10 = sshll.u32 %s3597_s6, 4  ;;  %2411 = vmatpush3.msra.mxu1 %v980_v19  ;;  %v1306_v27 = vld [vmem:[#allocation14] sm:$0xff]  ;;  %v1517_v28 = vld [vmem:[%s3517_s8 + $0x18] sm:$0xff]  ;;  %v1516_v29 = vld [vmem:[%s3517_s8 + $0x10] sm:$0xff]  ;;  %s3002_s25 = smov [#allocation17]  }
  0xbf   : > { %v1515_v30 = vld [vmem:[%s3517_s8 + $0x8] sm:$0xff]  ;;  %v3372_v31 = vld [vmem:[%s3319_s12] sm:$0xff] }
  0xc0   : > { %s820_s4 = scalar_lea.vmem %s3583_s27, %s3597_s6  ;;  %s3585_s6 = sld [smem:[#allocation26_spill]]  ;;  %v1514_v32 = vld [vmem:[%s3517_s8] sm:$0xff]  ;;  %v3381_v33 = vld [vmem:[%s3319_s12 + $0x8] sm:$0xff] }
  0xc1   : > { %s815_s16 = scalar_lea.vmem %s3584_s11, %s2330_s10  ;;  %v2277_v5 = vld [vmem:[%s820_s4] ss:$0 sm:$0xff]  ;;  %v2278_v6 = vld [vmem:[%s820_s4 + $0x1] ss:$0 sm:$0xff]  ;;  %v979_v34 = vld [vmem:[#allocation7 + $0x10] sm:$0xff]  ;;  %s3587_s12 = sld [smem:[#allocation32_spill]] }
  0xc2   : > { %v831_v1 = vld [vmem:[%s815_s16] sm:$0xff]  ;;  %v832_v2 = vld [vmem:[%s815_s16 + $0x8] sm:$0xff]  ;;  %v833_v3 = vld [vmem:[%s815_s16 + $0x10] sm:$0xff]  ;;  %2412 = vmatprep.subr.mxu1 %v979_v34  ;;  %s3588_s4 = sld [smem:[#allocation38_spill]]  ;;  %s2911_s11 = sshll.u32 %s3002_s25, 4  ;;  %s2912_s11 = int_to_ptr.vmem [resolvable:$false] %s2911_s11 }
  0xc3   : > { %v834_v4 = vld [vmem:[%s815_s16 + $0x18] sm:$0xff]  ;;  %v855_v7 = vsub.f32 %v831_v1, %v2277_v5  ;;  %v856_v8 = vsub.f32 %v832_v2, %v2277_v5  ;;  %v857_v10 = vsub.f32 %v833_v3, %v2278_v6  ;;  %2413 = vmatpush3.msra.mxu1 %v979_v34  ;;  %v978_v35 = vld [vmem:[#allocation7 + $0x8] sm:$0xff]  ;;  %v977_v36 = vld [vmem:[#allocation7] sm:$0xff]  ;;  %s3586_s16 = sld [smem:[#allocation37_spill]] }
  0xc4   : > { %v858_v11 = vsub.f32 %v834_v4, %v2278_v6  ;;  %2414 = vmatprep.subr.mxu1 %v978_v35  ;;  %v1201_v37 = vld [vmem:[#allocation13 + $0x18] sm:$0xff]  ;;  %v1200_v50 = vld [vmem:[#allocation13 + $0x10] sm:$0xff]  ;;  %v1199_v53 = vld [vmem:[#allocation13 + $0x8] sm:$0xff] }
  0xc5   : > { %v859_v12 = vand.u32 2147483647, %v855_v7  ;;  %v860_v13 = vand.u32 2147483647, %v856_v8  ;;  %v861_v14 = vand.u32 2147483647, %v857_v10  ;;  %2415 = vmatpush3.msra.mxu1 %v978_v35 }
  0xc6   : > { %s827_s14 = scalar_lea.vmem %s3585_s6, %s2330_s10  ;;  %v862_v16 = vand.u32 2147483647, %v858_v11  ;;  %2416 = vmatprep.subr.mxu1 %v977_v36  ;;  %v2279_v38 = vld [vmem:[%s3514_s5] ss:$0 sm:$0xff]  ;;  %v1198_v58 = vld [vmem:[#allocation13] sm:$0xff]  ;;  %v1408_v3 = vld [vmem:[#allocation16 + $0x10] sm:$0xff] }
  0xc7   : > { %2404 = vmatprep.mubr.msk.f32.mxu0 %vm871_vm1, %v859_v12  ;;  %v837_v18 = vld [vmem:[%s827_s14] sm:$0xff]  ;;  %v838_v22 = vld [vmem:[%s827_s14 + $0x8] sm:$0xff]  ;;  %v839_v23 = vld [vmem:[%s827_s14 + $0x10] sm:$0xff]  ;;  %2417 = vmatpush3.msra.mxu1 %v977_v36  ;;  %s809_s6 = scalar_lea.vmem [#allocation17], %s2260_s18  ;;  %s2332_s10 = sshll.u32 %s3131_s3, 8 }
  0xc8   : > { %2405 = vmatmul.mubr.msk.f32.vlgmr.msra.gmra.mxu0 %vm871_vm1, %v860_v13  ;;  %v840_v26 = vld [vmem:[%s827_s14 + $0x18] sm:$0xff]  ;;  %2438 = vmatprep.subr.mxu1 %v1201_v37  ;;  %v2290_v49 = vld [vmem:[%s3522_s13] ss:$0 sm:$0xff]  ;;  %v1407_v6 = vld [vmem:[#allocation16 + $0x8] sm:$0xff]  ;;  %s2063_s14 = sshll.u32 %s809_s6, 4  ;;  %s3464_s29 = scalar_lea.hbm %s3588_s4, %s2332_s10  ;;  %s3459_s14 = int_to_ptr.vmem [resolvable:$true] %s2063_s14 }
  0xc9   : > { %2425 = vmatpush3.msra.mxu0 %v1089_v9  ;;  %2407 = vmatprep.mubr.msk.f32.mxu0 %vm871_vm1, %v861_v14  ;;  %v1409_v61 = vld [vmem:[#allocation16 + $0x18] sm:$0xff]  ;;  %v1406_v11 = vld [vmem:[#allocation16] sm:$0xff]  ;;  %s2050_s3 = scalar_lea.sflag [#allocation4], %s3313_s20  ;;  %s2907_s18 = scalar_lea.vmem %s3459_s14, 256 }
  0xca   : > { %2426 = vmatprep.subr.mxu0 %v1088_v15  ;;  %v2300_v2 = vld [vmem:[%s3526_s17] ss:$0 sm:$0xff]  ;;  %p2908_p11 = scmp.ne.s32.totalorder %s3459_s14, %s2907_s18  ;;  %p2914_p6 = scmp.lt.s32.totalorder %s3459_s14, %s2912_s11 }
  0xcb   : > { %2427 = vmatpush3.msra.mxu0 %v1088_v15  ;;  %v1611_v14 = vld [vmem:[#allocation10 + $0x18] sm:$0xff] }
  0xcc   : > { %2428 = vmatprep.subr.mxu0 %v1087_v17  ;;  %2408 = vmatmul.mubr.msk.f32.gmra.mxu0 %vm871_vm1, %v862_v16  ;;  %v2310_v19 = vld [vmem:[%s3518_s9] ss:$0 sm:$0xff]  ;;  %p2909_p3 = pnand %p2908_p11, %p3589_p1 }
  0xcd   : > { %2429 = vmatpush3.msra.mxu0 %v1087_v17  ;;  %2432 = vmatprep.mubr.msk.f32.mxu0 %vm988_vm2, %v837_v18 }
  0xce   : > { %2430 = vmatprep.subr.mxu0 %v1086_v20  ;;  %p2910_p7 = pneg %p2909_p3 }
  0xcf   : > { %2431 = vmatpush3.msra.mxu0 %v1086_v20  ;;  %v1610_v20 = vld [vmem:[#allocation10 + $0x10] sm:$0xff] }
  0xd0   : > { %2452 = vmatprep.subr.mxu0 %v1309_v21  ;;  %2433 = vmatmul.mubr.msk.f32.vlgmr.msra.gmra.mxu0 %vm988_vm2, %v838_v22 }
  0xd1   : > { %2453 = vmatpush3.msra.mxu0 %v1309_v21  ;;  %2435 = vmatprep.mubr.msk.f32.mxu0 %vm988_vm2, %v839_v23 }
  0xd2   : > { %2454 = vmatprep.subr.mxu0 %v1308_v24 }
  0xd3   : > { %2455 = vmatpush3.msra.mxu0 %v1308_v24 }
  0xd4   : > { %2456 = vmatprep.subr.mxu0 %v1307_v25  ;;  %2436 = vmatmul.mubr.msk.f32.gmra.mxu0 %vm988_vm2, %v840_v26 }
  0xd5   : > { %2457 = vmatpush3.msra.mxu0 %v1307_v25  ;;  %2460 = vmatprep.mubr.msk.f32.mxu0 %vm988_vm2, %v837_v18 }
  0xd6   : > { %2458 = vmatprep.subr.mxu0 %v1306_v27 }
  0xd7   : > { %2459 = vmatpush3.msra.mxu0 %v1306_v27 }
  0xd8   : > { %2480 = vmatprep.subr.mxu0 %v1517_v28  ;;  %2461 = vmatmul.mubr.msk.f32.vlgmr.msra.gmra.mxu0 %vm988_vm2, %v838_v22 }
  0xd9   : > { %2481 = vmatpush3.msra.mxu0 %v1517_v28  ;;  %2463 = vmatprep.mubr.msk.f32.mxu0 %vm988_vm2, %v839_v23  ;;  %v1609_v23 = vld [vmem:[#allocation10 + $0x8] sm:$0xff]  ;;  %v1608_v28 = vld [vmem:[#allocation10] sm:$0xff] }
  0xda   : > { %2482 = vmatprep.subr.mxu0 %v1516_v29 }
  0xdb   : > { %2483 = vmatpush3.msra.mxu0 %v1516_v29 }
  0xdc   : > { %2484 = vmatprep.subr.mxu0 %v1515_v30  ;;  %2464 = vmatmul.mubr.msk.f32.gmra.mxu0 %vm988_vm2, %v840_v26 }
  0xdd   : > { %2485 = vmatpush3.msra.mxu0 %v1515_v30  ;;  %2488 = vmatprep.mubr.msk.f32.mxu0 %vm988_vm2, %v3372_v31 }
  0xde   : > { %2486 = vmatprep.subr.mxu0 %v1514_v32 }
  0xdf   : > { %2487 = vmatpush3.msra.mxu0 %v1514_v32  ;;  %v3000_v32 = vmov 0.0  }
  0xe0   : > { %2489 = vmatmul.mubr.msk.f32.vlgmr.msra.gmra.mxu0 %vm988_vm2, %v3381_v33  ;;  %2502 = vmatprep.subr.mxu0 %v3000_v32 }
  0xe1   : > { %2506 = vmatprep.mubr.msk.f32.mxu0 %vm3001_vm3, %v3000_v32 }
 0x188   : > { %v2406_v39 = vpop.f32.mrf.mxu0 }
 0x189   : > { %v960_v40 = vadd.f32 %v2406_v39, %v2279_v38  ;;  %v2295_v39 = vld [vmem:[%s3524_s15] ss:$0 sm:$0xff] }
 0x18a   : > { %v954_v41 = vpop.f32.mrf.mxu0 }
 0x18b   : > { %v955_v42 = vadd.f32 %v2279_v38, %v954_v41  ;;  %v974_v45 = vmax.f32 %v960_v40, 0.0 }
 0x18c   : > { %v2409_v43 = vpop.f32.mrf.mxu0 }
 0x18d   : > { %v973_v44 = vmax.f32 %v955_v42, 0.0  ;;  %v970_v46 = vadd.f32 %v2409_v43, %v2279_v38 }
 0x18e   : > { %v964_v47 = vpop.f32.mrf.mxu0 }
 0x18f   : > { %v965_v48 = vadd.f32 %v2279_v38, %v964_v47  ;;  %2418 = vmatprep.mubr.msk.f32.mxu1 %vm988_vm2, %v973_v44  ;;  %v976_v54 = vmax.f32 %v970_v46, 0.0 }
 0x190   : > { %2419 = vmatmul.mubr.msk.f32.vlgmr.msra.gmra.mxu1 %vm988_vm2, %v974_v45  ;;  %v2434_v51 = vpop.f32.mrf.mxu0 }
 0x191   : > { %v975_v52 = vmax.f32 %v965_v48, 0.0  ;;  %2439 = vmatpush3.msra.mxu1 %v1201_v37  ;;  %v1181_v55 = vadd.f32 %v2434_v51, %v2290_v49  ;;  %v2285_v37 = vld [vmem:[#allocation8] ss:$0 sm:$0xff] }
 0x192   : > { %2440 = vmatprep.subr.mxu1 %v1200_v50  ;;  %v1175_v56 = vpop.f32.mrf.mxu0 }
 0x193   : > { %v1176_v57 = vadd.f32 %v2290_v49, %v1175_v56  ;;  %2441 = vmatpush3.msra.mxu1 %v1200_v50  ;;  %2421 = vmatprep.mubr.msk.f32.mxu1 %vm988_vm2, %v975_v52  ;;  %v1195_v62 = vmax.f32 %v1181_v55, 0.0 }
 0x194   : > { %2442 = vmatprep.subr.mxu1 %v1199_v53  ;;  %2422 = vmatmul.mubr.msk.f32.gmra.mxu1 %vm988_vm2, %v976_v54  ;;  %v2437_v59 = vpop.f32.mrf.mxu0 }
 0x195   : > { %v1194_v60 = vmax.f32 %v1176_v57, 0.0  ;;  %2443 = vmatpush3.msra.mxu1 %v1199_v53  ;;  %v1191_v63 = vadd.f32 %v2437_v59, %v2290_v49 }
 0x196   : > { %2444 = vmatprep.subr.mxu1 %v1198_v58  ;;  %v1185_v0 = vpop.f32.mrf.mxu0 }
 0x197   : > { %v1186_v1 = vadd.f32 %v2290_v49, %v1185_v0  ;;  %2445 = vmatpush3.msra.mxu1 %v1198_v58  ;;  %2446 = vmatprep.mubr.msk.f32.mxu1 %vm988_vm2, %v1194_v60  ;;  %v1197_v7 = vmax.f32 %v1191_v63, 0.0  ;;  %v2305_v58 = vld [vmem:[%s3586_s16] ss:$0 sm:$0xff]  ;;  %s2913_s16 = scalar_lea.vmem %s2912_s11, 512 }
 0x198   : > { %2466 = vmatprep.subr.mxu1 %v1409_v61  ;;  %2447 = vmatmul.mubr.msk.f32.vlgmr.msra.gmra.mxu1 %vm988_vm2, %v1195_v62  ;;  %v2462_v4 = vpop.f32.mrf.mxu0  ;;  %v2313_v62 = vld [vmem:[%s3587_s12] ss:$0 sm:$0xff]  ;;  %p2915_p12 = scmp.lt.s32.totalorder %s2913_s16, %s2907_s18 }
 0x199   : > { %v1196_v5 = vmax.f32 %v1186_v1, 0.0  ;;  %2467 = vmatpush3.msra.mxu1 %v1409_v61  ;;  %v1389_v8 = vadd.f32 %v2462_v4, %v2300_v2 }
 0x19a   : > { %2468 = vmatprep.subr.mxu1 %v1408_v3  ;;  %v1383_v9 = vpop.f32.mrf.mxu0  ;;  %p2916_p13 = por %p2915_p12, %p2914_p6 }
 0x19b   : > { %v1384_v10 = vadd.f32 %v2300_v2, %v1383_v9  ;;  %2469 = vmatpush3.msra.mxu1 %v1408_v3  ;;  %2449 = vmatprep.mubr.msk.f32.mxu1 %vm988_vm2, %v1196_v5  ;;  %v1403_v15 = vmax.f32 %v1389_v8, 0.0 }
 0x19c   : > { %2470 = vmatprep.subr.mxu1 %v1407_v6  ;;  %2450 = vmatmul.mubr.msk.f32.gmra.mxu1 %vm988_vm2, %v1197_v7  ;;  %v2465_v12 = vpop.f32.mrf.mxu0  ;;  %p2917_p0 = pnand %p2916_p13, %p2910_p7 }
 0x19d   : > { %v1402_v13 = vmax.f32 %v1384_v10, 0.0  ;;  %2471 = vmatpush3.msra.mxu1 %v1407_v6  ;;  %v1399_v16 = vadd.f32 %v2465_v12, %v2300_v2 }
 0x19e   : > { %2472 = vmatprep.subr.mxu1 %v1406_v11  ;;  %v1393_v17 = vpop.f32.mrf.mxu0 }
 0x19f   : > { %v1394_v18 = vadd.f32 %v2300_v2, %v1393_v17  ;;  %2473 = vmatpush3.msra.mxu1 %v1406_v11  ;;  %2474 = vmatprep.mubr.msk.f32.mxu1 %vm988_vm2, %v1402_v13  ;;  %v1405_v24 = vmax.f32 %v1399_v16, 0.0 }
 0x1a0   : > { %2491 = vmatprep.subr.mxu1 %v1611_v14  ;;  %2475 = vmatmul.mubr.msk.f32.vlgmr.msra.gmra.mxu1 %vm988_vm2, %v1403_v15  ;;  %v2490_v21 = vpop.f32.mrf.mxu0 }
 0x1a1   : > { %v1404_v22 = vmax.f32 %v1394_v18, 0.0  ;;  %2492 = vmatpush3.msra.mxu1 %v1611_v14  ;;  %v1603_v25 = vadd.f32 %v2490_v21, %v2310_v19 }
 0x1a2   : > { %2493 = vmatprep.subr.mxu1 %v1610_v20  ;;  %v1597_v26 = vpop.f32.mrf.mxu0 }
 0x1a3   : > { %v1598_v27 = vadd.f32 %v2310_v19, %v1597_v26  ;;  %2494 = vmatpush3.msra.mxu1 %v1610_v20  ;;  %2477 = vmatprep.mubr.msk.f32.mxu1 %vm988_vm2, %v1404_v22  ;;  %v1607_v30 = vmax.f32 %v1603_v25, 0.0 }
 0x1a4   : > { %2495 = vmatprep.subr.mxu1 %v1609_v23  ;;  %2478 = vmatmul.mubr.msk.f32.gmra.mxu1 %vm988_vm2, %v1405_v24 }
 0x1a5   : > { %v1606_v29 = vmax.f32 %v1598_v27, 0.0  ;;  %2496 = vmatpush3.msra.mxu1 %v1609_v23 }
 0x1a6   : > { %2497 = vmatprep.subr.mxu1 %v1608_v28 }
 0x1a7   : > { %2498 = vmatpush3.msra.mxu1 %v1608_v28  ;;  %2499 = vmatprep.mubr.msk.f32.mxu1 %vm988_vm2, %v1606_v29 }
 0x1a8   : > { %2500 = vmatmul.mubr.msk.f32.vlgmr.msra.gmra.mxu1 %vm988_vm2, %v1607_v30  ;;  %2509 = vmatprep.subr.mxu1 %v3000_v32 }
 0x1a9   : > { %2513 = vmatprep.mubr.msk.f32.mxu1 %vm3001_vm3, %v3000_v32 }
 0x250   : > { %v2420_v34 = vpop.f32.mrf.mxu1 }
 0x251   : > { %v1073_v41 = vadd.f32 %v2420_v34, %v2285_v37 }
 0x252   : > { %v1067_v35 = vpop.f32.mrf.mxu1 }
 0x253   : > { %v1068_v47 = vadd.f32 %v2285_v37, %v1067_v35 }
 0x254   : > { %v2423_v36 = vpop.f32.mrf.mxu1 }
 0x255   : > { %v1083_v48 = vadd.f32 %v2423_v36, %v2285_v37 }
 0x256   : > { %v1077_v38 = vpop.f32.mrf.mxu1 }
 0x257   : > { %v1078_v55 = vadd.f32 %v2285_v37, %v1077_v38 }
 0x258   : > { %v2448_v40 = vpop.f32.mrf.mxu1 }
 0x259   : > { %v1293_v42 = vadd.f32 %v2448_v40, %v2295_v39 }
 0x25a   : > { %v1287_v43 = vpop.f32.mrf.mxu1 }
 0x25b   : > { %v1701_v44 = vadd.f32 %v1293_v42, %v1073_v41  ;;  %v1288_v45 = vadd.f32 %v2295_v39, %v1287_v43 }
 0x25c   : > { %v2451_v46 = vpop.f32.mrf.mxu1 }
 0x25d   : > { %v1303_v49 = vadd.f32 %v2451_v46, %v2295_v39  ;;  %2503 = vmatpush3.xpose.msk.msra.mxu0 %vm988_vm2, %v1701_v44  ;;  %v1700_v51 = vadd.f32 %v1288_v45, %v1068_v47 }
 0x25e   : > { %v1297_v50 = vpop.f32.mrf.mxu1  ;;  %2504 = vmatprep.subr.mxu0 %v3000_v32 }
 0x25f   : > { %v1703_v52 = vadd.f32 %v1303_v49, %v1083_v48  ;;  %v1298_v53 = vadd.f32 %v2295_v39, %v1297_v50 }
 0x260   : > { %v2476_v54 = vpop.f32.mrf.mxu1 }
 0x261   : > { %2505 = vmatpush3.xpose.msk.msra.mxu0 %vm988_vm2, %v1700_v51  ;;  %2510 = vmatpush3.xpose.msk.msra.mxu1 %vm988_vm2, %v1703_v52  ;;  %v1702_v57 = vadd.f32 %v1298_v53, %v1078_v55  ;;  %v1501_v4 = vadd.f32 %v2476_v54, %v2305_v58 }
 0x262   : > { %v1495_v56 = vpop.f32.mrf.mxu1  ;;  %2511 = vmatprep.subr.mxu1 %v3000_v32  ;;  %2516 = vmatprep.subr.mxu0 %v3000_v32 }
 0x263   : > { %v1496_v5 = vadd.f32 %v2305_v58, %v1495_v56 }
 0x264   : > { %v2479_v59 = vpop.f32.mrf.mxu1 }
 0x265   : > { %v3429_v60 = vadd.f32 %v2479_v59, %v2305_v58  ;;  %2512 = vmatpush3.xpose.msk.msra.mxu1 %vm988_vm2, %v1702_v57 }
 0x266   : > { %v1505_v61 = vpop.f32.mrf.mxu1 }
 0x267   : > { %v3435_v63 = vadd.f32 %v2305_v58, %v1505_v61 }
 0x268   : > { %v2501_v0 = vpop.f32.mrf.mxu1 }
 0x269   : > { %v1697_v1 = vadd.f32 %v2501_v0, %v2313_v62 }
 0x26a   : > { %v1691_v2 = vpop.f32.mrf.mxu1 }
 0x26b   : > { %v1692_v3 = vadd.f32 %v2313_v62, %v1691_v2  ;;  %2514 = vmatmul.mubr.msk.f32.vlgmr.msra.gmra.mxu1 %vm988_vm2, %v1697_v1 }
 0x26d   : > { %2507 = vmatmul.mubr.msk.f32.vlgmr.msra.gmra.mxu0 %vm988_vm2, %v1692_v3 }
 0x26e   : > { %2517 = vmatpush3.msra.mxu0 %v1501_v4  ;;  %2520 = vmatprep.mubr.msk.f32.mxu0 %vm3001_vm3, %v3000_v32 }
 0x26f   : > { %2518 = vmatprep.subr.mxu0 %v3000_v32 }
 0x270   : > { %2519 = vmatpush3.msra.mxu0 %v1496_v5 }
 0x271   : > { %2523 = vmatprep.subr.mxu0 %v3000_v32 }
 0x32b   : > { %v1858_v6 = vpop.f32.mrf.mxu1 }
 0x32c   : > { %v1870_v7 = vsel %vm1862_vm4, %v1858_v6, -inf }
 0x32d   : > { %v1871_v8 = vrot.slane %v1870_v7, 4  ;;  %v1779_v9 = vpop.f32.mrf.mxu0  ;;  %v2515_v10 = vpop.f32.mrf.mxu1 }
 0x32e   : > { %v1863_v11 = vsel %vm1862_vm4, %v1779_v9, -inf }
 0x32f   : > { %v1872_v12 = vmax.f32 %v1870_v7, %v1871_v8  ;;  %v1864_v13 = vrot.slane %v1863_v11, 4  ;;  %v2508_v14 = vpop.f32.mrf.mxu0 }
 0x331   : > { %v1873_v15 = vrot.slane %v1872_v12, 2  ;;  %v1865_v16 = vmax.f32 %v1863_v11, %v1864_v13 }
 0x333   : > { %v1874_v17 = vmax.f32 %v1872_v12, %v1873_v15  ;;  %v1866_v18 = vrot.slane %v1865_v16, 2 }
 0x335   : > { %v1875_v19 = vrot.slane %v1874_v17, 1  ;;  %v1867_v20 = vmax.f32 %v1865_v16, %v1866_v18 }
 0x337   : > { %v1876_v21 = vmax.f32 %v1874_v17, %v1875_v19  ;;  %v1868_v22 = vrot.slane %v1867_v20, 1 }
 0x339   : > { %v1878_v23 = vsub.f32 %v1858_v6, %v1876_v21  ;;  %v1869_v24 = vmax.f32 %v1867_v20, %v1868_v22 }
 0x33b   : > { %v1881_v25 = vmul.f32 1.442695, %v1878_v23  ;;  %v1877_v26 = vsub.f32 %v1779_v9, %v1869_v24 }
 0x33d   : > { %2663 = vpow2.f32 %v1881_v25  ;;  %v1879_v27 = vmul.f32 1.442695, %v1877_v26 }
 0x33f   : > { %2665 = vpow2.f32 %v1879_v27 }
 0x34a   : > { %v2664_v28 = vpop.eup %2663 }
 0x34b   : > { %v1890_v29 = vsel %vm1862_vm4, %v2664_v28, 0.0 }
 0x34c   : > { %v2666_v30 = vpop.eup %2665  ;;  %v1891_v34 = vrot.slane %v1890_v29, 4 }
 0x34d   : > { %v1883_v35 = vsel %vm1862_vm4, %v2666_v30, 0.0 }
 0x34e   : > { %v1892_v36 = vadd.f32 %v1891_v34, %v1890_v29  ;;  %v1884_v37 = vrot.slane %v1883_v35, 4 }
 0x350   : > { %v1893_v38 = vrot.slane %v1892_v36, 2  ;;  %v1885_v39 = vadd.f32 %v1884_v37, %v1883_v35 }
 0x352   : > { %v1894_v40 = vadd.f32 %v1893_v38, %v1892_v36  ;;  %v1886_v41 = vrot.slane %v1885_v39, 2 }
 0x354   : > { %v1895_v42 = vrot.slane %v1894_v40, 1  ;;  %v1887_v43 = vadd.f32 %v1886_v41, %v1885_v39 }
 0x356   : > { %v1888_v44 = vrot.slane %v1887_v43, 1  ;;  %v1896_v45 = vadd.f32 %v1895_v42, %v1894_v40 }
 0x358   : > { %v1889_v46 = vadd.f32 %v1888_v44, %v1887_v43 }
 0x35a   : > { %2667 = vrcp.f32 %v1889_v46 }
 0x35b   : > { %2669 = vrcp.f32 %v1896_v45 }
 0x367   : > { %v2668_v47 = vpop.eup %2667 }
 0x368   : > { %v1899_v48 = vmul.f32 %v2668_v47, %v2666_v30  ;;  %v2670_v49 = vpop.eup %2669 }
 0x369   : > { %v1900_v50 = vmul.f32 %v2670_v49, %v2664_v28 }
 0x36a   : > { %2521 = vmatmul.mubr.msk.f32.vlgmr.msra.gmra.mxu0 %vm1862_vm4, %v1899_v48 }
 0x36b   : > { %2524 = vmatpush3.msra.mxu0 %v3429_v60  ;;  %2527 = vmatprep.mubr.msk.f32.mxu0 %vm3001_vm3, %v3000_v32 }
 0x36c   : > { %2525 = vmatprep.subr.mxu0 %v3000_v32 }
 0x36d   : > { %2526 = vmatpush3.msra.mxu0 %v3435_v63 }
 0x36e   : > { %2528 = vmatmul.mubr.msk.f32.vlgmr.msra.gmra.mxu0 %vm1862_vm4, %v1900_v50 }
 0x42a   : > { %v1970_v51 = vpop.f32.mrf.mxu0 }
 0x42b   : > { %v1971_v52 = vadd.f32 %v1970_v51, %v3372_v31 }
 0x42c   : > { %v2522_v53 = vpop.f32.mrf.mxu0 }
 0x42d   : > { %2047 = vst.msk [vmem:[%s809_s6] sm:$0xff] %vm988_vm2, %v1971_v52 }
 0x42e   : > { %v2043_v32 = vpop.f32.mrf.mxu0 }
 0x42f   : > { %v2044_v54 = vadd.f32 %v2043_v32, %v3381_v33 }
 0x430   : > { %v2529_v55 = vpop.f32.mrf.mxu0 }
 0x431   : > { %2048 = vst.msk [vmem:[%s809_s6 + $0x8] sm:$0xff] %vm988_vm2, %v2044_v54 }
 0x432   : > { %2920 = shalt.err (!%p2917_p0)
}
 0x433   : > { %s2921_s28 = scalar_lea.hbm %s3464_s29, 256  ;;  %s2925_s6 = scalar_lea.hbm %s3588_s4, 512 }
 0x434   : > { %p2922_p4 = scmp.ne.s32.totalorder %s3464_s29, %s2921_s28  ;;  %p2926_p8 = scmp.lt.s32.totalorder %s3464_s29, %s3588_s4 }
 0x435   : > { %p2927_p9 = scmp.lt.s32.totalorder %s2925_s6, %s2921_s28 }
 0x436   : > { %p2923_p2 = pnand %p2922_p4, %p3589_p1 }
 0x437   : > { %p2928_p10 = por %p2927_p9, %p2926_p8 }
 0x438   : > { %p2924_p5 = pneg %p2923_p2 }
 0x43a   : > { %p2929_p11 = pnand %p2928_p10, %p2924_p5 }
 0x43c   : > { %2932 = shalt.err (!%p2929_p11)
}
 0x43d   : > { %s3003_s27 = smov 128   ;;  %s3004_s18 = smov 8  }
 0x43e   : > { %2564 = dma.vmem_to_hbm [thread:$0]  (%p3589_p1), %s3459_s14, 256, %s3464_s29, %s2050_s3, %s3003_s27, %s3003_s27, %s3004_s18  }
 0x43f PF: > { %s2078_s25 = sand.u32 1, %s2975_s1   ;;  %p3590_p3 = scmp.ne.s32.totalorder %s3568_s21, 0 }
 0x440   : > { %p3591_p7 = scmp.ge.s32.totalorder %s2987_s24, 2  ;;  %s2079_s11 = scalar_lea.sflag [#allocation4], %s2078_s25 }
 0x442   : > { %p2596_p6 = pnand %p3591_p7, %p3590_p3 }
 0x444   : > { %p2597_p12 = pneg %p2596_p6 }
 0x446   : > { %2970 = dma.done.wait (%p2597_p12), %s2079_s11, 256  }
 0x447   : > { %2972 = vsyncadd (%p2597_p12), %s2079_s11, 4294967040  ;;  %p37_p13 = scmp.ge.s32.totalorder %s3238_s0, 4   ;;  %s3592_s1 = smov %s2979_s22 }
 0x448   : > { %s3593_s22 = smov %s2983_s23  ;;  %s3594_s23 = smov %s3249_s7 }
 0x449   : > { %s3595_s24 = smov %s3238_s0  ;;  %39 = sbr.rel (!%p37_p13) target bundleno = 25 (0x19), region = 186 }
 0x44e   :  { %2084 = vsyncpa [#allocation3], 1 }
 0x44f   :  { %2086 = vsyncpa [#allocation3 + $0x1], 1 }
 0x450   :  { %2087 = vsyncpa [#allocation6], 1 }
 0x451   :  { %2088 = vsyncpa [#allocation9], 1 }
 0x452   :  { %2089 = vsyncpa [#allocation12], 1 }
 0x453   :  { %2090 = vsyncpa [#allocation15], 1 }
 0x454   :  { %2091 = vsyncpa [#allocation4], 1 }
 0x455   :  { %2093 = vsyncpa [#allocation4 + $0x1], 1 }

</bundles_post_ra>
